<compile_context>
chip_gen: v5e
topology: v5e:2x2
jax: 0.10.0
libtpu: 0.0.40
codegen_flags: <defaults>
</compile_context>

<pallas_src>
import math

import jax
import jax.numpy as jnp
from jax.experimental import pallas as pl
from jax.experimental.pallas import tpu as pltpu

LANE = 128      # vreg lane width: hidden/output dims padded to a multiple of this
ROW_TILE = 16   # batch-tile granularity (bf16 sublane packing; also a multiple of 8 for f32)


def _round_up(n, m):
    return ((n + m - 1) // m) * m


def _cdiv(a, b):
    return -(-a // b)


def make_mlp_kernel(num_layers):
    """Fused MLP forward: (Linear -> ReLU) * (L-1) -> Linear.

    refs = (w1, b1, w2, b2, ..., wL, bL, out). Hidden/output dims are pre-padded to 128
    lanes so every dot is MXU-dense; accumulation, bias-add and ReLU run in f32, and the
    activation is cast back to the weight dtype (bf16) only at each dot input.
    """
    def kernel(x_ref, *refs):
        o_ref = refs[-1]
        h = x_ref[...]                                      # (tb, in_features) bf16
        for k in range(num_layers):
            w_ref, b_ref = refs[2 * k], refs[2 * k + 1]
            acc = jnp.dot(h.astype(w_ref.dtype), w_ref[...],
                          preferred_element_type=jnp.float32) + b_ref[...]
            h = jnp.maximum(acc, 0.0) if k < num_layers - 1 else acc
        # True scalar output lives in column 0 of the lane-padded last layer; the store
        # target is a narrow (tb, 1) block so only useful bytes hit HBM.
        o_ref[...] = h[:, :1].astype(o_ref.dtype)
    return kernel


def multiple_regression_forward(x, padded_params, *, max_batch_tile=2048):
    """Run the fused MLP kernel. `padded_params` come from `pad_params`.

    Returns (batch, 1) float32 — same semantics as the PyTorch module with ReLU
    (bf16 matmul inputs, f32 accumulation).
    """
    batch, in_features = x.shape
    num_layers = len(padded_params) // 2
    stream_dtype = padded_params[0].dtype           # weight / x streaming dtype (bf16)

    # ---- batch tiling: bounded padding waste + >=2 (even) steps for v7x megacore -----
    batch_pad = _round_up(batch, ROW_TILE)
    n_steps = _cdiv(batch_pad, max_batch_tile)
    if batch_pad >= 2 * ROW_TILE:
        n_steps = max(n_steps, 2)                   # don't leave a v7x TensorCore idle
        n_steps += n_steps % 2                      # even step count -> balanced split
    tb = _round_up(_cdiv(batch_pad, n_steps), ROW_TILE)
    batch_pad = _round_up(batch_pad, tb)            # waste bounded by < tb rows
    grid = (batch_pad // tb,)

    # ---- input: batch-pad + bf16 cast only; the feature dim stays UNPADDED in HBM ----
    if batch_pad == batch and x.dtype == stream_dtype:
        x_p = x
    else:
        x_p = jnp.zeros((batch_pad, in_features), stream_dtype)
        x_p = x_p.at[:batch, :].set(x.astype(stream_dtype))

    # ---- BlockSpecs: x/out walk the batch grid; params stay resident (constant maps) --
    in_specs = [pl.BlockSpec((tb, in_features), lambda i: (i, 0))]
    for w, b in zip(padded_params[0::2], padded_params[1::2]):
        in_specs.append(pl.BlockSpec(w.shape, lambda i: (0, 0)))
        in_specs.append(pl.BlockSpec(b.shape, lambda i: (0, 0)))
    # TODO(synk): single-buffer the resident params (pipeline_mode=pl.Buffered(1)) once
    #             hidden widths grow enough for double-buffered params to pressure v7x VMEM.
    out_spec = pl.BlockSpec((tb, 1), lambda i: (i, 0))

    # ---- VMEM budget: tiles + (double-buffered) params + per-layer intermediates ------
    param_bytes = sum(int(p.size) * p.dtype.itemsize for p in padded_params)
    widths = [int(w.shape[1]) for w in padded_params[0::2]]
    tile_bytes = 2 * (tb * in_features * x_p.dtype.itemsize + tb * 1 * 4)   # x/out, 2-deep
    act_bytes = sum(tb * w for w in widths) * (4 + 2)                       # f32 h + bf16 copy
    vmem_limit = tile_bytes + 2 * param_bytes + act_bytes + (2 << 20)
    vmem_limit = int(min(max(vmem_limit, 8 << 20), 48 << 20))               # 48MiB: v7x headroom

    # Advisory cost estimate for the XLA scheduler.
    flops = 2 * batch_pad * sum(int(w.shape[0]) * int(w.shape[1])
                                for w in padded_params[0::2])
    bytes_accessed = int(x_p.size * x_p.dtype.itemsize + batch_pad * 4 + param_bytes)
    cost = pl.CostEstimate(flops=flops, transcendentals=0, bytes_accessed=bytes_accessed)

    out = pl.pallas_call(
        make_mlp_kernel(num_layers),
        out_shape=jax.ShapeDtypeStruct((batch_pad, 1), jnp.float32),
        grid_spec=pltpu.PrefetchScalarGridSpec(
            num_scalar_prefetch=0,
            grid=grid,
            in_specs=in_specs,
            out_specs=out_spec,
        ),
        compiler_params=pltpu.CompilerParams(
            dimension_semantics=("parallel",),   # shards the batch grid across v7x's 2 TCs
            vmem_limit_bytes=vmem_limit,
        ),
        cost_estimate=cost,
    )(x_p, *padded_params)

    return out[:batch, :]


def init_params(key, input_size, layers_config):
    """nn.Linear-style init. Layer k: weight (in_k, out_k), bias (1, out_k). Unpadded f32."""
    dims = [input_size] + list(layers_config) + [1]
    params = []
    for k in range(len(dims) - 1):
        key, wk, bk = jax.random.split(key, 3)
        bound = 1.0 / math.sqrt(dims[k])
        w = jax.random.uniform(wk, (dims[k], dims[k + 1]), jnp.float32, -bound, bound)
        b = jax.random.uniform(bk, (1, dims[k + 1]), jnp.float32, -bound, bound)
        params += [w, b]
    return tuple(params)


def pad_params(params, lane=LANE, weight_dtype=jnp.bfloat16):
    """Lane-pad hidden/output dims to 128-lane multiples; the FIRST layer's input dim is
    left unpadded (x streams unpadded from HBM). Weights are stored bf16 for the MXU;
    biases stay f32 (bias-add / ReLU run in f32). Zero padding is exact: padded columns
    compute to 0 and padded output columns are sliced away.
    """
    padded = []
    n = len(params) // 2
    for k in range(n):
        w, b = params[2 * k], params[2 * k + 1]
        in_p = w.shape[0] if k == 0 else _round_up(w.shape[0], lane)
        out_p = _round_up(w.shape[1], lane)
        w_p = jnp.zeros((in_p, out_p), weight_dtype).at[: w.shape[0], : w.shape[1]].set(
            w.astype(weight_dtype))
        b_p = jnp.zeros((1, out_p), jnp.float32).at[:, : b.shape[1]].set(
            b.astype(jnp.float32))
        padded += [w_p, b_p]
    return tuple(padded)


def reference_forward(x, params, compute_dtype=jnp.float32):
    """Pure-JAX reference on the unpadded weights; compute_dtype mimics matmul-input precision."""
    n = len(params) // 2
    h = x
    for k in range(n):
        w, b = params[2 * k], params[2 * k + 1]
        h = jnp.dot(h.astype(compute_dtype), w.astype(compute_dtype),
                    preferred_element_type=jnp.float32) + b
        if k < n - 1:
            h = jnp.maximum(h, 0.0)
    return h


if __name__ == "__main__":
    input_size = 16
    layers_config = (32, 32)   # two hidden layers, ReLU activation
    batch = 8

    key = jax.random.PRNGKey(0)
    key, xkey = jax.random.split(key)
    x = jax.random.normal(xkey, (batch, input_size), jnp.float32)

    params = init_params(key, input_size, layers_config)   # true (unpadded, f32) weights
    padded_params = pad_params(params)                     # stored lane-padded bf16 format

    out = multiple_regression_forward(x, padded_params)
    out = jax.block_until_ready(out)
    assert out.shape == (batch, 1), out.shape

    # Exact-precision check against a reference with matching bf16-input / f32-accum math.
    ref_mixed = reference_forward(x, params, compute_dtype=jnp.bfloat16)
    assert jnp.allclose(out, ref_mixed, atol=1e-4, rtol=1e-4), "mismatch vs bf16-precision reference"
    # Loose sanity check against the full-f32 reference (tolerance widened for bf16 streaming).
    ref_f32 = reference_forward(x, params, compute_dtype=jnp.float32)
    assert jnp.allclose(out, ref_f32, atol=3e-2, rtol=3e-2), "mismatch vs f32 reference"

    print("KERNEL_OK")
</pallas_src>

<mosaic_0001>
module attributes {stable_mosaic.version = 11 : i64} {
  func.func @kernel(%arg0: i32, %arg1: memref<16x16xbf16, #tpu.memory_space<vmem>>, %arg2: memref<16x128xbf16, #tpu.memory_space<vmem>>, %arg3: memref<1x128xf32, #tpu.memory_space<vmem>>, %arg4: memref<128x128xbf16, #tpu.memory_space<vmem>>, %arg5: memref<1x128xf32, #tpu.memory_space<vmem>>, %arg6: memref<128x128xbf16, #tpu.memory_space<vmem>>, %arg7: memref<1x128xf32, #tpu.memory_space<vmem>>, %arg8: memref<16x1xf32, #tpu.memory_space<vmem>>) attributes {dimension_semantics = [#tpu.dimension_semantics<parallel>], iteration_bounds = array<i64: 1>, scalar_prefetch = 0 : i64, scratch_operands = 0 : i64, tpu.core_type = #tpu.core_type<tc>, window_params = [{transform_indices = @transform_0, window_bounds = array<i64: 16, 16>}, {pipeline_mode = #tpu.pipeline_mode<synchronous>, transform_indices = @transform_1, window_bounds = array<i64: 16, 128>}, {pipeline_mode = #tpu.pipeline_mode<synchronous>, transform_indices = @transform_2, window_bounds = array<i64: 1, 128>}, {pipeline_mode = #tpu.pipeline_mode<synchronous>, transform_indices = @transform_3, window_bounds = array<i64: 128, 128>}, {pipeline_mode = #tpu.pipeline_mode<synchronous>, transform_indices = @transform_4, window_bounds = array<i64: 1, 128>}, {pipeline_mode = #tpu.pipeline_mode<synchronous>, transform_indices = @transform_5, window_bounds = array<i64: 128, 128>}, {pipeline_mode = #tpu.pipeline_mode<synchronous>, transform_indices = @transform_6, window_bounds = array<i64: 1, 128>}, {transform_indices = @transform_7, window_bounds = array<i64: 16, 1>}]} {
    %c0 = arith.constant 0 : index
    %c0_0 = arith.constant 0 : index
    %0 = vector.load %arg1[%c0, %c0_0] : memref<16x16xbf16, #tpu.memory_space<vmem>>, vector<16x16xbf16>
    %c0_1 = arith.constant 0 : index
    %c0_2 = arith.constant 0 : index
    %1 = vector.load %arg2[%c0_1, %c0_2] : memref<16x128xbf16, #tpu.memory_space<vmem>>, vector<16x128xbf16>
    %cst = arith.constant dense<0.000000e+00> : vector<16x128xf32>
    %2 = tpu.matmul %0, %1, %cst {dimension_numbers = #tpu.dot_dimension_numbers<[1], [0], [0], [1], [0, 0, 1, 1], [], []>} : vector<16x16xbf16>, vector<16x128xbf16>, vector<16x128xf32> -> vector<16x128xf32>
    %c0_3 = arith.constant 0 : index
    %c0_4 = arith.constant 0 : index
    %3 = vector.load %arg3[%c0_3, %c0_4] : memref<1x128xf32, #tpu.memory_space<vmem>>, vector<1x128xf32>
    %4 = vector.broadcast %3 : vector<1x128xf32> to vector<16x128xf32>
    %5 = arith.addf %2, %4 : vector<16x128xf32>
    %cst_5 = arith.constant 0.000000e+00 : f32
    %6 = vector.broadcast %cst_5 : f32 to vector<16x128xf32>
    %7 = arith.maximumf %5, %6 : vector<16x128xf32>
    %8 = arith.truncf %7 : vector<16x128xf32> to vector<16x128xbf16>
    %c0_6 = arith.constant 0 : index
    %c0_7 = arith.constant 0 : index
    %9 = vector.load %arg4[%c0_6, %c0_7] : memref<128x128xbf16, #tpu.memory_space<vmem>>, vector<128x128xbf16>
    %cst_8 = arith.constant dense<0.000000e+00> : vector<16x128xf32>
    %10 = tpu.matmul %8, %9, %cst_8 {dimension_numbers = #tpu.dot_dimension_numbers<[1], [0], [0], [1], [0, 0, 1, 1], [], []>} : vector<16x128xbf16>, vector<128x128xbf16>, vector<16x128xf32> -> vector<16x128xf32>
    %c0_9 = arith.constant 0 : index
    %c0_10 = arith.constant 0 : index
    %11 = vector.load %arg5[%c0_9, %c0_10] : memref<1x128xf32, #tpu.memory_space<vmem>>, vector<1x128xf32>
    %12 = vector.broadcast %11 : vector<1x128xf32> to vector<16x128xf32>
    %13 = arith.addf %10, %12 : vector<16x128xf32>
    %cst_11 = arith.constant 0.000000e+00 : f32
    %14 = vector.broadcast %cst_11 : f32 to vector<16x128xf32>
    %15 = arith.maximumf %13, %14 : vector<16x128xf32>
    %16 = arith.truncf %15 : vector<16x128xf32> to vector<16x128xbf16>
    %c0_12 = arith.constant 0 : index
    %c0_13 = arith.constant 0 : index
    %17 = vector.load %arg6[%c0_12, %c0_13] : memref<128x128xbf16, #tpu.memory_space<vmem>>, vector<128x128xbf16>
    %cst_14 = arith.constant dense<0.000000e+00> : vector<16x128xf32>
    %18 = tpu.matmul %16, %17, %cst_14 {dimension_numbers = #tpu.dot_dimension_numbers<[1], [0], [0], [1], [0, 0, 1, 1], [], []>} : vector<16x128xbf16>, vector<128x128xbf16>, vector<16x128xf32> -> vector<16x128xf32>
    %c0_15 = arith.constant 0 : index
    %c0_16 = arith.constant 0 : index
    %19 = vector.load %arg7[%c0_15, %c0_16] : memref<1x128xf32, #tpu.memory_space<vmem>>, vector<1x128xf32>
    %20 = vector.broadcast %19 : vector<1x128xf32> to vector<16x128xf32>
    %21 = arith.addf %18, %20 : vector<16x128xf32>
    %22 = vector.extract_strided_slice %21 {offsets = [0, 0], sizes = [16, 1], strides = [1, 1]} : vector<16x128xf32> to vector<16x1xf32>
    %c0_17 = arith.constant 0 : index
    %c0_18 = arith.constant 0 : index
    %23 = vector.load %arg8[%c0_17, %c0_18] : memref<16x1xf32, #tpu.memory_space<vmem>>, vector<16x1xf32>
    tpu.vector_store %arg8[%c0_17, %c0_18], %22 {strides = array<i32>} : memref<16x1xf32, #tpu.memory_space<vmem>>, vector<16x1xf32>,
    return
  }
  func.func @transform_0(%arg0: i32) -> (i32, i32) {
    %c0_i32 = arith.constant 0 : i32
    %c0_i32_0 = arith.constant 0 : i32
    return %arg0, %c0_i32 : i32, i32
  }
  func.func @transform_1(%arg0: i32) -> (i32, i32) {
    %c0_i32 = arith.constant 0 : i32
    %c0_i32_0 = arith.constant 0 : i32
    %c0_i32_1 = arith.constant 0 : i32
    return %c0_i32, %c0_i32_0 : i32, i32
  }
  func.func @transform_2(%arg0: i32) -> (i32, i32) {
    %c0_i32 = arith.constant 0 : i32
    %c0_i32_0 = arith.constant 0 : i32
    %c0_i32_1 = arith.constant 0 : i32
    return %c0_i32, %c0_i32_0 : i32, i32
  }
  func.func @transform_3(%arg0: i32) -> (i32, i32) {
    %c0_i32 = arith.constant 0 : i32
    %c0_i32_0 = arith.constant 0 : i32
    %c0_i32_1 = arith.constant 0 : i32
    return %c0_i32, %c0_i32_0 : i32, i32
  }
  func.func @transform_4(%arg0: i32) -> (i32, i32) {
    %c0_i32 = arith.constant 0 : i32
    %c0_i32_0 = arith.constant 0 : i32
    %c0_i32_1 = arith.constant 0 : i32
    return %c0_i32, %c0_i32_0 : i32, i32
  }
  func.func @transform_5(%arg0: i32) -> (i32, i32) {
    %c0_i32 = arith.constant 0 : i32
    %c0_i32_0 = arith.constant 0 : i32
    %c0_i32_1 = arith.constant 0 : i32
    return %c0_i32, %c0_i32_0 : i32, i32
  }
  func.func @transform_6(%arg0: i32) -> (i32, i32) {
    %c0_i32 = arith.constant 0 : i32
    %c0_i32_0 = arith.constant 0 : i32
    %c0_i32_1 = arith.constant 0 : i32
    return %c0_i32, %c0_i32_0 : i32, i32
  }
  func.func @transform_7(%arg0: i32) -> (i32, i32) {
    %c0_i32 = arith.constant 0 : i32
    %c0_i32_0 = arith.constant 0 : i32
    return %arg0, %c0_i32 : i32, i32
  }
}

</mosaic_0001>

<bundles_post_ra>
// kernel: tpu_custom_call.1
= control target key start
LH: loop header
LB: loop body
LE: loop exit
PB: predicated region body
PF: predicated region fallthrough
CT: control target
= control target key end

     0   :  { %12 = vsyncpa [#allocation3], 0  ;;  %s582_s0 = inlined_call_operand.hbm [shape: bf16[16,16], index: 0, kind: input, shape index: {}]   ;;  %s583_s1 = inlined_call_operand.hbm [shape: bf16[16,128], index: 1, kind: input, shape index: {}]   ;;  %s584_s2 = inlined_call_operand.vmem [shape: f32[1,128], index: 2, kind: input, shape index: {}]   ;;  %s585_s3 = inlined_call_operand.hbm [shape: bf16[128,128], index: 3, kind: input, shape index: {}]   ;;  %s586_s4 = inlined_call_operand.vmem [shape: f32[1,128], index: 4, kind: input, shape index: {}]   ;;  %s587_s5 = inlined_call_operand.hbm [shape: bf16[128,128], index: 5, kind: input, shape index: {}]   ;;  %s588_s6 = inlined_call_operand.vmem [shape: f32[1,128], index: 6, kind: input, shape index: {}]   ;;  %s589_s7 = inlined_call_operand.vmem [shape: f32[16,1], index: 7, kind: output, shape index: {}]  }
   0x1   :  { %13 = vsyncpa [#allocation5], 0 }
   0x2   :  { %14 = vsyncpa [#allocation8], 0  ;;  %s32_s26 = sshll.u32 %s583_s1, 4  ;;  %s509_s27 = smov [#allocation4]   ;;  %s33_s26 = int_to_ptr.hbm [resolvable:$true] %s32_s26 }
   0x3   :  { %s34_s28 = sshll.u32 %s509_s27, 4  ;;  %s19_s8 = sshll.u32 %s582_s0, 4  ;;  %s35_s28 = int_to_ptr.vmem [resolvable:$true] %s34_s28  ;;  %s20_s8 = int_to_ptr.hbm [resolvable:$true] %s19_s8 }
   0x4   :  { %s510_s9 = smov 64   ;;  %s511_s10 = smov 4  }
   0x5   :  { %40 = dma.hbm_to_vmem [thread:$0]  %s33_s26, 128, %s35_s28, [#allocation5], %s510_s9, %s510_s9, %s511_s10  }
   0x6   :  { %s512_s11 = smov [#allocation2]   ;;  %s47_s15 = sshll.u32 %s585_s3, 4  ;;  %s48_s15 = int_to_ptr.hbm [resolvable:$true] %s47_s15 }
   0x7   :  { %s21_s12 = sshll.u32 %s512_s11, 4  ;;  %s62_s17 = sshll.u32 %s587_s5, 4  ;;  %s22_s12 = int_to_ptr.vmem [resolvable:$true] %s21_s12  ;;  %s63_s17 = int_to_ptr.hbm [resolvable:$true] %s62_s17 }
   0x8   :  { %27 = dma.hbm_to_vmem [thread:$0]  %s20_s8, 128, %s22_s12, [#allocation3], %s510_s9, %s510_s9, %s511_s10  }
   0x9   :  { %s513_s18 = smov [#allocation6]   ;;  %s514_s0 = smov [#allocation7]  }
   0xa   :  { %s49_s19 = sshll.u32 %s513_s18, 4  ;;  %s64_s20 = sshll.u32 %s514_s0, 4  ;;  %s50_s19 = int_to_ptr.vmem [resolvable:$true] %s49_s19  ;;  %s65_s20 = int_to_ptr.vmem [resolvable:$true] %s64_s20 }
   0xb   :  { %55 = dma.hbm_to_vmem [thread:$0]  %s48_s15, 1024, %s50_s19, [#allocation5], %s510_s9, %s510_s9, %s511_s10  }
   0xc   :  { %70 = dma.hbm_to_vmem [thread:$0]  %s63_s17, 1024, %s65_s20, [#allocation8], %s510_s9, %s510_s9, %s511_s10  }
   0xd   :  { %503 = dma.done.wait [#allocation3], 128  }
   0xe   :  { %504 = vsyncadd [#allocation3], 4294967168 }
   0xf   :  { %505 = dma.done.wait [#allocation5], 1152  }
  0x10   :  { %506 = vsyncadd [#allocation5], 4294966144 }
  0x11   :  { %507 = dma.done.wait [#allocation8], 1024  }
  0x12   :  { %508 = vsyncadd [#allocation8], 4294966272  ;;  %v381_v0 = vld [vmem:[#allocation4] sm:$0xff]  ;;  %v380_v2 = vld [vmem:[#allocation2] sm:$0xff]  ;;  %vm109_vm0 = vcmask 130048   ;;  %vm297_vm1 = vcmask 7168  }
  0x13   :  { %v389_v1 = vld [vmem:[#allocation6 + $0x38] sm:$0xff]  ;;  %120 = vmatpush.bf16.msra.mxu0 %v381_v0  ;;  %v388_v3 = vld [vmem:[#allocation6 + $0x30] sm:$0xff]  ;;  %v387_v4 = vld [vmem:[#allocation6 + $0x28] sm:$0xff] }
  0x14   :  { %198 = vmatpush.bf16.msra.mxu1 %v389_v1  ;;  %v386_v5 = vld [vmem:[#allocation6 + $0x20] sm:$0xff]  ;;  %v385_v6 = vld [vmem:[#allocation6 + $0x18] sm:$0xff]  ;;  %v384_v7 = vld [vmem:[#allocation6 + $0x10] sm:$0xff] }
  0x15   :  { %v383_v8 = vld [vmem:[#allocation6 + $0x8] sm:$0xff]  ;;  %v382_v9 = vld [vmem:[#allocation6] sm:$0xff]  ;;  %v397_v10 = vld [vmem:[#allocation7 + $0x38] sm:$0xff] }
  0x16   :  { %315 = vmatmul.msk.bf16.vlgmr.msra.gmra.mxu0 %vm109_vm0, %v380_v2  ;;  %283 = vmatpush.bf16.msra.mxu2 %v397_v10  ;;  %v396_v11 = vld [vmem:[#allocation7 + $0x30] sm:$0xff]  ;;  %v395_v12 = vld [vmem:[#allocation7 + $0x28] sm:$0xff]  ;;  %v394_v13 = vld [vmem:[#allocation7 + $0x20] sm:$0xff] }
  0x17   :  { %v404_v15 = vld [vmem:[%s584_s2] ss:$0 sm:$0xff]  ;;  %v393_v22 = vld [vmem:[#allocation7 + $0x18] sm:$0xff]  ;;  %v391_v24 = vld [vmem:[#allocation7 + $0x8] sm:$0xff] }
  0x18   :  { %199 = vmatpush.bf16.msra.mxu1 %v388_v3  ;;  %v392_v23 = vld [vmem:[#allocation7 + $0x10] sm:$0xff]  ;;  %v390_v25 = vld [vmem:[#allocation7] sm:$0xff] }
  0x19   :  { %v405_v27 = vld [vmem:[%s586_s4] ss:$0 sm:$0xff] }
  0x1a   :  { %284 = vmatpush.bf16.msra.mxu2 %v396_v11  ;;  %v406_v34 = vld [vmem:[%s588_s6] ss:$0 sm:$0xff] }
  0x1c   :  { %200 = vmatpush.bf16.msra.mxu1 %v387_v4 }
  0x1e   :  { %285 = vmatpush.bf16.msra.mxu2 %v395_v12 }
  0x20   :  { %201 = vmatpush.bf16.msra.mxu1 %v386_v5 }
  0x22   :  { %286 = vmatpush.bf16.msra.mxu2 %v394_v13 }
  0x24   :  { %202 = vmatpush.bf16.msra.mxu1 %v385_v6 }
  0x26   :  { %287 = vmatpush.bf16.msra.mxu2 %v393_v22 }
  0x28   :  { %203 = vmatpush.bf16.msra.mxu1 %v384_v7 }
  0x2a   :  { %288 = vmatpush.bf16.msra.mxu2 %v392_v23 }
  0x2c   :  { %204 = vmatpush.bf16.msra.mxu1 %v383_v8 }
  0x2e   :  { %289 = vmatpush.bf16.msra.mxu2 %v391_v24 }
  0x30   :  { %205 = vmatpush.bf16.msra.mxu1 %v382_v9 }
  0x32   :  { %290 = vmatpush.bf16.msra.mxu2 %v390_v25 }
  0x93   :  { %v122_v14 = vpop.f32.mrf.mxu0 }
  0x94   :  { %v123_v16 = vadd.f32 %v404_v15, %v122_v14 }
  0x96   :  { %v127_v19 = vmax.f32 %v123_v16, 0.0 }
  0x9b   :  { %v124_v17 = vpop.f32.mrf.mxu0 }
  0x9c   :  { %v125_v18 = vadd.f32 %v404_v15, %v124_v17 }
  0x9e   :  { %v128_v20 = vmax.f32 %v125_v18, 0.0 }
  0xa0   :  { %v129_v21 = vpack.c.bf16 %v128_v20, %v127_v19 }
  0xa2   :  { %206 = vmatmul.bf16.vlgmr.msra.gmra.mxu1 %v129_v21 }
 0x11f   :  { %v207_v26 = vpop.f32.mrf.mxu1 }
 0x120   :  { %v208_v28 = vadd.f32 %v405_v27, %v207_v26 }
 0x122   :  { %v212_v31 = vmax.f32 %v208_v28, 0.0 }
 0x127   :  { %v209_v29 = vpop.f32.mrf.mxu1 }
 0x128   :  { %v210_v30 = vadd.f32 %v405_v27, %v209_v29 }
 0x12a   :  { %v213_v32 = vmax.f32 %v210_v30, 0.0 }
 0x12c   :  { %v214_v33 = vpack.c.bf16 %v213_v32, %v212_v31 }
 0x12e   :  { %291 = vmatmul.bf16.vlgmr.msra.gmra.mxu2 %v214_v33 }
 0x1b1   :  { %v292_v35 = vpop.f32.mrf.mxu2 }
 0x1b2   :  { %v293_v36 = vadd.f32 %v406_v34, %v292_v35 }
 0x1b4   :  { %298 = vst.msk [vmem:[%s589_s7] sm:$0xff] %vm297_vm1, %v293_v36 }
 0x1b9   :  { %v294_v37 = vpop.f32.mrf.mxu2 }
 0x1ba   :  { %v295_v38 = vadd.f32 %v406_v34, %v294_v37 }
 0x1bc   :  { %299 = vst.msk [vmem:[%s589_s7 + $0x8] sm:$0xff] %vm297_vm1, %v295_v38 }
 0x1bd   :  { %304 = vsyncpa [#allocation3], 1 }
 0x1be   :  { %305 = vsyncpa [#allocation5], 1 }
 0x1bf   :  { %306 = vsyncpa [#allocation8], 1 }

</bundles_post_ra>
